<compile_context>
chip_gen: v6e
topology: v6e:2x2x1
jax: 0.10.0
libtpu: 0.0.40
codegen_flags: <defaults>
</compile_context>

<pallas_src>
import functools

import jax
import jax.numpy as jnp
from jax.experimental import pallas as pl
from jax.experimental.pallas import tpu as pltpu


def _round_up(v, m):
    return (v + m - 1) // m * m


# ---------------------------------------------------------------------------
# Fused kernel: concat(c, x) -> MLP -> (mu, clamp(logVar)) epilogue
# ---------------------------------------------------------------------------
def _gaussian_mlp_kernel(n_layers, split_output, mu_pad, *refs):
    """refs = (c, x, W0c, W0x, b0, W1, b1, ..., W_{L-1}, b_{L-1}, mu[, logVar])."""
    n_out = 2 if split_output else 1
    c_ref, x_ref = refs[0], refs[1]
    out_refs = refs[len(refs) - n_out:]
    p = refs[2:len(refs) - n_out]

    # Layer 0: fused concat -> two matmuls against the row-split weight.
    w0c, w0x, b0 = p[0], p[1], p[2]
    h = jnp.dot(c_ref[...].astype(w0c.dtype), w0c[...],
                preferred_element_type=jnp.float32)
    h = h + jnp.dot(x_ref[...].astype(w0x.dtype), w0x[...],
                    preferred_element_type=jnp.float32)
    h = h + b0[...].astype(jnp.float32)
    if n_layers > 1:
        h = jnp.maximum(h, 0.0)                       # ReLU (VPU)

    for l in range(1, n_layers):
        w = p[3 + 2 * (l - 1)]
        b = p[4 + 2 * (l - 1)]
        h = jnp.dot(h.astype(w.dtype), w[...], preferred_element_type=jnp.float32)
        h = h + b[...].astype(jnp.float32)
        if l < n_layers - 1:                          # GaussianModel: linear last layer
            h = jnp.maximum(h, 0.0)

    if split_output:
        mu_ref, lv_ref = out_refs
        mu_ref[...] = h[:, :mu_pad].astype(mu_ref.dtype)
        lv_ref[...] = jnp.clip(h[:, mu_pad:2 * mu_pad], -16.0, 16.0).astype(lv_ref.dtype)
    else:
        out_refs[0][...] = h.astype(out_refs[0].dtype)


# ---------------------------------------------------------------------------
# One-time parameter preparation (pad + optional bf16 cast) — cached by caller
# ---------------------------------------------------------------------------
def prepare_gaussian_params(params, condition_dim, *, forced_logVar=None,
                            param_dtype=None):
    """Pre-pad (and optionally pre-cast) GaussianModel params once.

    params = [(W (in, out), b (1, out)), ...]; params[0] acts on concat([c, x]).
    Returns a dict consumed by gaussian_model_forward (no per-call padding).
    """
    n_layers = len(params)
    in_dim = params[0][0].shape[0]
    target_dim = in_dim - condition_dim
    model_out = params[-1][0].shape[1]
    split = forced_logVar is None
    output_dim = model_out // 2 if split else model_out
    mu_pad = _round_up(output_dim, 128)

    cast = (lambda a: a.astype(param_dtype)) if param_dtype is not None else (lambda a: a)

    # TODO(synk): pad hidden widths > 128 to multiples of 256 on v6e/v7x
    # (2x256x256 MXU); 128 already matches v5e and these small CVAE widths.
    out_pads = [_round_up(w.shape[1], 128) for w, _ in params[:-1]]
    out_pads.append(2 * mu_pad if split else mu_pad)

    def pad_w(w, rows_pad, cols_pad, is_last):
        r, c = w.shape
        wp = jnp.zeros((rows_pad, cols_pad), w.dtype)
        if is_last and split:
            # mu columns at [0:output_dim], logVar columns at [mu_pad:mu_pad+output_dim]
            wp = wp.at[:r, :output_dim].set(w[:, :output_dim])
            wp = wp.at[:r, mu_pad:mu_pad + output_dim].set(w[:, output_dim:])
        else:
            wp = wp.at[:r, :c].set(w)
        return cast(wp)

    def pad_b(b, cols_pad, is_last):
        b2 = b.reshape(1, -1)
        c = b2.shape[1]
        bp = jnp.zeros((1, cols_pad), b2.dtype)
        if is_last and split:
            bp = bp.at[:, :output_dim].set(b2[:, :output_dim])
            bp = bp.at[:, mu_pad:mu_pad + output_dim].set(b2[:, output_dim:])
        else:
            bp = bp.at[:, :c].set(b2)
        return cast(bp)

    flat = []
    w0, b0 = params[0]
    last0 = (n_layers == 1)
    flat.append(pad_w(w0[:condition_dim], condition_dim, out_pads[0], last0))  # W0c
    flat.append(pad_w(w0[condition_dim:], target_dim, out_pads[0], last0))     # W0x
    flat.append(pad_b(b0, out_pads[0], last0))
    for l in range(1, n_layers):
        w, b = params[l]
        last = (l == n_layers - 1)
        flat.append(pad_w(w, out_pads[l - 1], out_pads[l], last))
        flat.append(pad_b(b, out_pads[l], last))

    param_bytes = sum(int(a.size) * a.dtype.itemsize for a in flat)
    return dict(flat_params=flat, n_layers=n_layers, split=split,
                condition_dim=condition_dim, target_dim=target_dim,
                output_dim=output_dim, mu_pad=mu_pad, out_pads=out_pads,
                forced_logVar=forced_logVar, param_bytes=param_bytes)


def _vmem_budget_bytes():
    """Generation-aware (working budget, vmem_limit cap)."""
    try:
        cap = pltpu.get_tpu_info().vmem_capacity_bytes
    except Exception:
        cap = 128 * 1024 * 1024
    if cap <= 64 * 1024 * 1024:                       # v7x: 64 MiB per TensorCore
        return 44 * 1024 * 1024, 56 * 1024 * 1024
    return 96 * 1024 * 1024, 110 * 1024 * 1024        # v5e / v6e: 128 MiB


# ---------------------------------------------------------------------------
# GaussianModel forward
# ---------------------------------------------------------------------------
def gaussian_model_forward(c, x, prep, *, batch_tile=512):
    """GaussianModel.forward(c, x) -> [mu, logVar]."""
    B, cd = c.shape
    Bx, td = x.shape
    assert B == Bx and cd == prep["condition_dim"] and td == prep["target_dim"]
    out_dtype = c.dtype
    split = prep["split"]
    mu_pad = prep["mu_pad"]
    out_dim = prep["output_dim"]
    n_out = 2 if split else 1

    # ---- batch tile: sublane-aligned to activation dtype, prefer >=2 steps
    sub = max(8, 32 // c.dtype.itemsize)              # 8 f32 / 16 bf16 / 32 int8
    B_al = _round_up(B, sub)
    bt = max(sub, min(_round_up(batch_tile, sub), B_al))
    if B_al >= 2 * sub and bt >= B_al:                # >=2 grid steps -> v7x megacore
        bt = _round_up((B_al + 1) // 2, sub)

    # ---- generation-aware VMEM budget -------------------------------------
    budget, limit_cap = _vmem_budget_bytes()
    max_h = max(prep["out_pads"])

    def act_bytes(tile):
        io_in = 2 * tile * (cd + td) * c.dtype.itemsize            # double-buffered in
        io_out = 2 * tile * n_out * mu_pad * jnp.dtype(out_dtype).itemsize
        mid = 3 * tile * max_h * 4                                  # live f32 activations
        return io_in + io_out + mid

    while bt > sub and prep["param_bytes"] + act_bytes(bt) > budget:
        bt = max(sub, _round_up(bt // 2, sub))
    # TODO(synk): if param_bytes alone exceeds the budget (very wide/deep nets,
    # esp. under v7x's 64 MiB/TC), tile the widest layer over its out_features
    # on an extra "arbitrary" grid axis instead of keeping all weights resident.
    vmem_limit = min(limit_cap,
                     max(32 * 1024 * 1024,
                         int(1.3 * (prep["param_bytes"] + act_bytes(bt)))))

    B_pad = _round_up(B, bt)
    if B_pad != B:
        c_p = jnp.zeros((B_pad, cd), c.dtype).at[:B].set(c)
        x_p = jnp.zeros((B_pad, td), x.dtype).at[:B].set(x)
    else:
        c_p, x_p = c, x
    grid = (B_pad // bt,)

    const_idx = lambda i: (0, 0)
    batch_idx = lambda i: (i, 0)
    in_specs = [pl.BlockSpec((bt, cd), batch_idx),
                pl.BlockSpec((bt, td), batch_idx)]
    for a in prep["flat_params"]:
        # Constant blocks across the grid -> single buffer (saves VMEM).
        in_specs.append(pl.BlockSpec(a.shape, const_idx,
                                     pipeline_mode=pl.Buffered(1)))

    if split:
        out_specs = (pl.BlockSpec((bt, mu_pad), batch_idx),
                     pl.BlockSpec((bt, mu_pad), batch_idx))
        out_shape = (jax.ShapeDtypeStruct((B_pad, mu_pad), out_dtype),
                     jax.ShapeDtypeStruct((B_pad, mu_pad), out_dtype))
    else:
        out_specs = pl.BlockSpec((bt, mu_pad), batch_idx)
        out_shape = jax.ShapeDtypeStruct((B_pad, mu_pad), out_dtype)

    kernel = functools.partial(_gaussian_mlp_kernel,
                               prep["n_layers"], split, mu_pad)

    res = pl.pallas_call(
        kernel,
        out_shape=out_shape,
        grid_spec=pl.GridSpec(grid=grid, in_specs=in_specs, out_specs=out_specs),
        compiler_params=pltpu.CompilerParams(
            dimension_semantics=("parallel",),
            vmem_limit_bytes=vmem_limit,
        ),
    )(c_p, x_p, *prep["flat_params"])

    if split:
        mu, logVar = res
        mu = mu[:B, :out_dim]
        logVar = logVar[:B, :out_dim]
    else:
        mu = res[:B, :out_dim]
        logVar = jnp.full((B, out_dim), prep["forced_logVar"], out_dtype)
    return [mu, logVar]


def gaussian_sample(mu, logVar, key):
    """GaussianModel.sample: mu + exp(0.5*logVar) * N(0, 1)."""
    return mu + jnp.exp(0.5 * logVar) * jax.random.normal(key, mu.shape, mu.dtype)


# ---------------------------------------------------------------------------
# Parameter init (matches BlockModel: xavier-uniform W, torch-default bias)
# ---------------------------------------------------------------------------
def init_block_model_params(key, input_dim, output_dim, width, depth,
                            dtype=jnp.float32):
    dims = ([input_dim] + [width] * depth + [output_dim]) if depth > 0 \
        else [input_dim, output_dim]
    params = []
    for fan_in, fan_out in zip(dims[:-1], dims[1:]):
        key, kw, kb = jax.random.split(key, 3)
        bound_w = jnp.sqrt(6.0 / (fan_in + fan_out))
        w = jax.random.uniform(kw, (fan_in, fan_out), jnp.float32,
                               minval=-bound_w, maxval=bound_w).astype(dtype)
        bound_b = 1.0 / jnp.sqrt(float(fan_in))
        b = jax.random.uniform(kb, (1, fan_out), jnp.float32,
                               minval=-bound_b, maxval=bound_b).astype(dtype)
        params.append((w, b))
    return params


def init_gaussian_model_params(key, condition_dim, target_dim, output_dim,
                               width, depth, forced_logVar=None,
                               dtype=jnp.float32):
    input_dim = condition_dim + target_dim
    model_out = output_dim * 2 if forced_logVar is None else output_dim
    return init_block_model_params(key, input_dim, model_out, width, depth, dtype)


# ---------------------------------------------------------------------------
# Pure-JAX reference
# ---------------------------------------------------------------------------
def gaussian_model_reference(c, x, params, forced_logVar=None):
    h = jnp.concatenate([c, x], axis=-1)
    for l, (w, b) in enumerate(params):
        h = h @ w + b
        if l < len(params) - 1:
            h = jnp.maximum(h, 0.0)
    if forced_logVar is None:
        mu, logVar = jnp.split(h, 2, axis=-1)
        logVar = jnp.clip(logVar, -16.0, 16.0)
    else:
        mu, logVar = h, jnp.full_like(h, forced_logVar)
    return mu, logVar


if __name__ == "__main__":
    batch = 16
    condition_dim = 12
    target_dim = 4
    output_dim = 8
    width = 32
    depth = 3

    key = jax.random.PRNGKey(0)
    key, kc, kx = jax.random.split(key, 3)
    c = jax.random.normal(kc, (batch, condition_dim), jnp.float32)
    x = jax.random.normal(kx, (batch, target_dim), jnp.float32)

    # --- Case 1: learned logVar (forced_logVar=None), f32 params ----------
    params = init_gaussian_model_params(key, condition_dim, target_dim,
                                        output_dim, width, depth,
                                        forced_logVar=None)
    prep = prepare_gaussian_params(params, condition_dim, forced_logVar=None)
    mu, logVar = gaussian_model_forward(c, x, prep)
    mu, logVar = jax.block_until_ready((mu, logVar))
    mu_ref, lv_ref = gaussian_model_reference(c, x, params, None)
    assert mu.shape == (batch, output_dim) and logVar.shape == (batch, output_dim)
    assert jnp.allclose(mu, mu_ref, atol=1e-4, rtol=1e-4), "mu mismatch"
    assert jnp.allclose(logVar, lv_ref, atol=1e-4, rtol=1e-4), "logVar mismatch"

    # --- Case 2: forced logVar -> single-output kernel, constant logVar ---
    params2 = init_gaussian_model_params(jax.random.PRNGKey(1), condition_dim,
                                         target_dim, output_dim, width, depth,
                                         forced_logVar=-2.0)
    prep2 = prepare_gaussian_params(params2, condition_dim, forced_logVar=-2.0)
    mu2, logVar2 = gaussian_model_forward(c, x, prep2)
    mu2, logVar2 = jax.block_until_ready((mu2, logVar2))
    mu2_ref, lv2_ref = gaussian_model_reference(c, x, params2, -2.0)
    assert jnp.allclose(mu2, mu2_ref, atol=1e-4, rtol=1e-4), "forced mu mismatch"
    assert jnp.allclose(logVar2, lv2_ref, atol=1e-4, rtol=1e-4), "forced logVar mismatch"

    # --- Case 3: bf16 resident weights (fast MXU path), f32 accumulation ---
    prep_bf16 = prepare_gaussian_params(params, condition_dim, forced_logVar=None,
                                        param_dtype=jnp.bfloat16)
    mu3, logVar3 = gaussian_model_forward(c, x, prep_bf16)
    mu3, logVar3 = jax.block_until_ready((mu3, logVar3))
    assert jnp.allclose(mu3, mu_ref, atol=8e-2, rtol=5e-2), "bf16 mu mismatch"
    assert jnp.allclose(logVar3, lv_ref, atol=8e-2, rtol=5e-2), "bf16 logVar mismatch"

    # --- reparameterization sample (GaussianModel.sample equivalent) ------
    z = jax.block_until_ready(gaussian_sample(mu, logVar, jax.random.PRNGKey(2)))
    assert z.shape == mu.shape

    print("KERNEL_OK")
</pallas_src>

<mosaic_0001>
module attributes {stable_mosaic.version = 11 : i64} {
  func.func @_gaussian_mlp_kernel(%arg0: i32, %arg1: memref<8x12xf32, #tpu.memory_space<vmem>>, %arg2: memref<8x4xf32, #tpu.memory_space<vmem>>, %arg3: memref<12x128xf32, #tpu.memory_space<vmem>>, %arg4: memref<4x128xf32, #tpu.memory_space<vmem>>, %arg5: memref<1x128xf32, #tpu.memory_space<vmem>>, %arg6: memref<128x128xf32, #tpu.memory_space<vmem>>, %arg7: memref<1x128xf32, #tpu.memory_space<vmem>>, %arg8: memref<128x128xf32, #tpu.memory_space<vmem>>, %arg9: memref<1x128xf32, #tpu.memory_space<vmem>>, %arg10: memref<128x256xf32, #tpu.memory_space<vmem>>, %arg11: memref<1x256xf32, #tpu.memory_space<vmem>>, %arg12: memref<8x128xf32, #tpu.memory_space<vmem>>, %arg13: memref<8x128xf32, #tpu.memory_space<vmem>>) attributes {dimension_semantics = [#tpu.dimension_semantics<parallel>], iteration_bounds = array<i64: 2>, scalar_prefetch = 0 : i64, scratch_operands = 0 : i64, tpu.core_type = #tpu.core_type<tc>, window_params = [{transform_indices = @transform_0, window_bounds = array<i64: 8, 12>}, {transform_indices = @transform_1, window_bounds = array<i64: 8, 4>}, {pipeline_mode = #tpu.pipeline_mode<synchronous>, transform_indices = @transform_2, window_bounds = array<i64: 12, 128>}, {pipeline_mode = #tpu.pipeline_mode<synchronous>, transform_indices = @transform_3, window_bounds = array<i64: 4, 128>}, {pipeline_mode = #tpu.pipeline_mode<synchronous>, transform_indices = @transform_4, window_bounds = array<i64: 1, 128>}, {pipeline_mode = #tpu.pipeline_mode<synchronous>, transform_indices = @transform_5, window_bounds = array<i64: 128, 128>}, {pipeline_mode = #tpu.pipeline_mode<synchronous>, transform_indices = @transform_6, window_bounds = array<i64: 1, 128>}, {pipeline_mode = #tpu.pipeline_mode<synchronous>, transform_indices = @transform_7, window_bounds = array<i64: 128, 128>}, {pipeline_mode = #tpu.pipeline_mode<synchronous>, transform_indices = @transform_8, window_bounds = array<i64: 1, 128>}, {pipeline_mode = #tpu.pipeline_mode<synchronous>, transform_indices = @transform_9, window_bounds = array<i64: 128, 256>}, {pipeline_mode = #tpu.pipeline_mode<synchronous>, transform_indices = @transform_10, window_bounds = array<i64: 1, 256>}, {transform_indices = @transform_11, window_bounds = array<i64: 8, 128>}, {transform_indices = @transform_12, window_bounds = array<i64: 8, 128>}]} {
    %c0 = arith.constant 0 : index
    %c0_0 = arith.constant 0 : index
    %0 = vector.load %arg1[%c0, %c0_0] : memref<8x12xf32, #tpu.memory_space<vmem>>, vector<8x12xf32>
    %c0_1 = arith.constant 0 : index
    %c0_2 = arith.constant 0 : index
    %1 = vector.load %arg3[%c0_1, %c0_2] : memref<12x128xf32, #tpu.memory_space<vmem>>, vector<12x128xf32>
    %cst = arith.constant dense<0.000000e+00> : vector<8x128xf32>
    %2 = tpu.matmul %0, %1, %cst {dimension_numbers = #tpu.dot_dimension_numbers<[1], [0], [0], [1], [0, 0, 1, 1], [], []>} : vector<8x12xf32>, vector<12x128xf32>, vector<8x128xf32> -> vector<8x128xf32>
    %c0_3 = arith.constant 0 : index
    %c0_4 = arith.constant 0 : index
    %3 = vector.load %arg2[%c0_3, %c0_4] : memref<8x4xf32, #tpu.memory_space<vmem>>, vector<8x4xf32>
    %c0_5 = arith.constant 0 : index
    %c0_6 = arith.constant 0 : index
    %4 = vector.load %arg4[%c0_5, %c0_6] : memref<4x128xf32, #tpu.memory_space<vmem>>, vector<4x128xf32>
    %cst_7 = arith.constant dense<0.000000e+00> : vector<8x128xf32>
    %5 = tpu.matmul %3, %4, %cst_7 {dimension_numbers = #tpu.dot_dimension_numbers<[1], [0], [0], [1], [0, 0, 1, 1], [], []>} : vector<8x4xf32>, vector<4x128xf32>, vector<8x128xf32> -> vector<8x128xf32>
    %6 = arith.addf %2, %5 : vector<8x128xf32>
    %c0_8 = arith.constant 0 : index
    %c0_9 = arith.constant 0 : index
    %7 = vector.load %arg5[%c0_8, %c0_9] : memref<1x128xf32, #tpu.memory_space<vmem>>, vector<1x128xf32>
    %8 = vector.broadcast %7 : vector<1x128xf32> to vector<8x128xf32>
    %9 = arith.addf %6, %8 : vector<8x128xf32>
    %cst_10 = arith.constant 0.000000e+00 : f32
    %10 = vector.broadcast %cst_10 : f32 to vector<8x128xf32>
    %11 = arith.maximumf %9, %10 : vector<8x128xf32>
    %c0_11 = arith.constant 0 : index
    %c0_12 = arith.constant 0 : index
    %12 = vector.load %arg6[%c0_11, %c0_12] : memref<128x128xf32, #tpu.memory_space<vmem>>, vector<128x128xf32>
    %cst_13 = arith.constant dense<0.000000e+00> : vector<8x128xf32>
    %13 = tpu.matmul %11, %12, %cst_13 {dimension_numbers = #tpu.dot_dimension_numbers<[1], [0], [0], [1], [0, 0, 1, 1], [], []>} : vector<8x128xf32>, vector<128x128xf32>, vector<8x128xf32> -> vector<8x128xf32>
    %c0_14 = arith.constant 0 : index
    %c0_15 = arith.constant 0 : index
    %14 = vector.load %arg7[%c0_14, %c0_15] : memref<1x128xf32, #tpu.memory_space<vmem>>, vector<1x128xf32>
    %15 = vector.broadcast %14 : vector<1x128xf32> to vector<8x128xf32>
    %16 = arith.addf %13, %15 : vector<8x128xf32>
    %cst_16 = arith.constant 0.000000e+00 : f32
    %17 = vector.broadcast %cst_16 : f32 to vector<8x128xf32>
    %18 = arith.maximumf %16, %17 : vector<8x128xf32>
    %c0_17 = arith.constant 0 : index
    %c0_18 = arith.constant 0 : index
    %19 = vector.load %arg8[%c0_17, %c0_18] : memref<128x128xf32, #tpu.memory_space<vmem>>, vector<128x128xf32>
    %cst_19 = arith.constant dense<0.000000e+00> : vector<8x128xf32>
    %20 = tpu.matmul %18, %19, %cst_19 {dimension_numbers = #tpu.dot_dimension_numbers<[1], [0], [0], [1], [0, 0, 1, 1], [], []>} : vector<8x128xf32>, vector<128x128xf32>, vector<8x128xf32> -> vector<8x128xf32>
    %c0_20 = arith.constant 0 : index
    %c0_21 = arith.constant 0 : index
    %21 = vector.load %arg9[%c0_20, %c0_21] : memref<1x128xf32, #tpu.memory_space<vmem>>, vector<1x128xf32>
    %22 = vector.broadcast %21 : vector<1x128xf32> to vector<8x128xf32>
    %23 = arith.addf %20, %22 : vector<8x128xf32>
    %cst_22 = arith.constant 0.000000e+00 : f32
    %24 = vector.broadcast %cst_22 : f32 to vector<8x128xf32>
    %25 = arith.maximumf %23, %24 : vector<8x128xf32>
    %c0_23 = arith.constant 0 : index
    %c0_24 = arith.constant 0 : index
    %26 = vector.load %arg10[%c0_23, %c0_24] : memref<128x256xf32, #tpu.memory_space<vmem>>, vector<128x256xf32>
    %cst_25 = arith.constant dense<0.000000e+00> : vector<8x256xf32>
    %27 = tpu.matmul %25, %26, %cst_25 {dimension_numbers = #tpu.dot_dimension_numbers<[1], [0], [0], [1], [0, 0, 1, 1], [], []>} : vector<8x128xf32>, vector<128x256xf32>, vector<8x256xf32> -> vector<8x256xf32>
    %c0_26 = arith.constant 0 : index
    %c0_27 = arith.constant 0 : index
    %28 = vector.load %arg11[%c0_26, %c0_27] : memref<1x256xf32, #tpu.memory_space<vmem>>, vector<1x256xf32>
    %29 = vector.broadcast %28 : vector<1x256xf32> to vector<8x256xf32>
    %30 = arith.addf %27, %29 : vector<8x256xf32>
    %31 = vector.extract_strided_slice %30 {offsets = [0, 0], sizes = [8, 128], strides = [1, 1]} : vector<8x256xf32> to vector<8x128xf32>
    %c0_28 = arith.constant 0 : index
    %c0_29 = arith.constant 0 : index
    %32 = vector.load %arg12[%c0_28, %c0_29] : memref<8x128xf32, #tpu.memory_space<vmem>>, vector<8x128xf32>
    tpu.vector_store %arg12[%c0_28, %c0_29], %31 {strides = array<i32>} : memref<8x128xf32, #tpu.memory_space<vmem>>, vector<8x128xf32>,
    %33 = vector.extract_strided_slice %30 {offsets = [0, 128], sizes = [8, 128], strides = [1, 1]} : vector<8x256xf32> to vector<8x128xf32>
    %cst_30 = arith.constant -1.600000e+01 : f32
    %cst_31 = arith.constant 1.600000e+01 : f32
    %34 = vector.broadcast %cst_30 : f32 to vector<8x128xf32>
    %35 = arith.maximumf %34, %33 : vector<8x128xf32>
    %36 = vector.broadcast %cst_31 : f32 to vector<8x128xf32>
    %37 = arith.minimumf %36, %35 : vector<8x128xf32>
    %c0_32 = arith.constant 0 : index
    %c0_33 = arith.constant 0 : index
    %38 = vector.load %arg13[%c0_32, %c0_33] : memref<8x128xf32, #tpu.memory_space<vmem>>, vector<8x128xf32>
    tpu.vector_store %arg13[%c0_32, %c0_33], %37 {strides = array<i32>} : memref<8x128xf32, #tpu.memory_space<vmem>>, vector<8x128xf32>,
    return
  }
  func.func @transform_0(%arg0: i32) -> (i32, i32) {
    %c0_i32 = arith.constant 0 : i32
    %c0_i32_0 = arith.constant 0 : i32
    return %arg0, %c0_i32 : i32, i32
  }
  func.func @transform_1(%arg0: i32) -> (i32, i32) {
    %c0_i32 = arith.constant 0 : i32
    %c0_i32_0 = arith.constant 0 : i32
    return %arg0, %c0_i32 : i32, i32
  }
  func.func @transform_2(%arg0: i32) -> (i32, i32) {
    %c0_i32 = arith.constant 0 : i32
    %c0_i32_0 = arith.constant 0 : i32
    %c0_i32_1 = arith.constant 0 : i32
    return %c0_i32, %c0_i32_0 : i32, i32
  }
  func.func @transform_3(%arg0: i32) -> (i32, i32) {
    %c0_i32 = arith.constant 0 : i32
    %c0_i32_0 = arith.constant 0 : i32
    %c0_i32_1 = arith.constant 0 : i32
    return %c0_i32, %c0_i32_0 : i32, i32
  }
  func.func @transform_4(%arg0: i32) -> (i32, i32) {
    %c0_i32 = arith.constant 0 : i32
    %c0_i32_0 = arith.constant 0 : i32
    %c0_i32_1 = arith.constant 0 : i32
    return %c0_i32, %c0_i32_0 : i32, i32
  }
  func.func @transform_5(%arg0: i32) -> (i32, i32) {
    %c0_i32 = arith.constant 0 : i32
    %c0_i32_0 = arith.constant 0 : i32
    %c0_i32_1 = arith.constant 0 : i32
    return %c0_i32, %c0_i32_0 : i32, i32
  }
  func.func @transform_6(%arg0: i32) -> (i32, i32) {
    %c0_i32 = arith.constant 0 : i32
    %c0_i32_0 = arith.constant 0 : i32
    %c0_i32_1 = arith.constant 0 : i32
    return %c0_i32, %c0_i32_0 : i32, i32
  }
  func.func @transform_7(%arg0: i32) -> (i32, i32) {
    %c0_i32 = arith.constant 0 : i32
    %c0_i32_0 = arith.constant 0 : i32
    %c0_i32_1 = arith.constant 0 : i32
    return %c0_i32, %c0_i32_0 : i32, i32
  }
  func.func @transform_8(%arg0: i32) -> (i32, i32) {
    %c0_i32 = arith.constant 0 : i32
    %c0_i32_0 = arith.constant 0 : i32
    %c0_i32_1 = arith.constant 0 : i32
    return %c0_i32, %c0_i32_0 : i32, i32
  }
  func.func @transform_9(%arg0: i32) -> (i32, i32) {
    %c0_i32 = arith.constant 0 : i32
    %c0_i32_0 = arith.constant 0 : i32
    %c0_i32_1 = arith.constant 0 : i32
    return %c0_i32, %c0_i32_0 : i32, i32
  }
  func.func @transform_10(%arg0: i32) -> (i32, i32) {
    %c0_i32 = arith.constant 0 : i32
    %c0_i32_0 = arith.constant 0 : i32
    %c0_i32_1 = arith.constant 0 : i32
    return %c0_i32, %c0_i32_0 : i32, i32
  }
  func.func @transform_11(%arg0: i32) -> (i32, i32) {
    %c0_i32 = arith.constant 0 : i32
    %c0_i32_0 = arith.constant 0 : i32
    return %arg0, %c0_i32 : i32, i32
  }
  func.func @transform_12(%arg0: i32) -> (i32, i32) {
    %c0_i32 = arith.constant 0 : i32
    %c0_i32_0 = arith.constant 0 : i32
    return %arg0, %c0_i32 : i32, i32
  }
}

</mosaic_0001>

<bundles_post_ra>
// kernel: tpu_custom_call.1
= control target key start
LH: loop header
LB: loop body
LE: loop exit
PB: predicated region body
PF: predicated region fallthrough
CT: control target
= control target key end

     0   :  { %s1927_s0 = inlined_call_operand.vmem [shape: f32[16,12], index: 0, kind: input, shape index: {}]   ;;  %s1928_s1 = inlined_call_operand.vmem [shape: f32[16,4], index: 1, kind: input, shape index: {}]   ;;  %s1929_s2 = inlined_call_operand.hbm [shape: f32[12,128], index: 2, kind: input, shape index: {}]   ;;  %s1930_s3 = inlined_call_operand.vmem [shape: f32[4,128], index: 3, kind: input, shape index: {}]   ;;  %s1931_s4 = inlined_call_operand.vmem [shape: f32[1,128], index: 4, kind: input, shape index: {}]   ;;  %s1932_s5 = inlined_call_operand.hbm [shape: f32[128,128], index: 5, kind: input, shape index: {}]   ;;  %s1933_s6 = inlined_call_operand.vmem [shape: f32[1,128], index: 6, kind: input, shape index: {}]   ;;  %s1934_s7 = inlined_call_operand.hbm [shape: f32[128,128], index: 7, kind: input, shape index: {}]   ;;  %s1935_s8 = inlined_call_operand.vmem [shape: f32[1,128], index: 8, kind: input, shape index: {}]   ;;  %s1936_s9 = inlined_call_operand.hbm [shape: f32[128,256], index: 9, kind: input, shape index: {}]   ;;  %s1937_s10 = inlined_call_operand.vmem [shape: f32[1,256], index: 10, kind: input, shape index: {}]   ;;  %s1938_s11 = inlined_call_operand.hbm [shape: f32[16,128], index: 11, kind: output, shape index: {0}]   ;;  %s1939_s12 = inlined_call_operand.hbm [shape: f32[16,128], index: 12, kind: output, shape index: {1}]  }
   0x1   :  { %1946 = sst [smem:[#allocation21_spill]] %s1927_s0 }
   0x2   :  { %1947 = sst [smem:[#allocation22_spill]] %s1928_s1 }
   0x3   :  { %1948 = sst [smem:[#allocation23_spill]] %s1929_s2 }
   0x4   :  { %18 = vsyncpa [#allocation3], 0 }
   0x5   :  { %19 = vsyncpa [#allocation6], 0 }
   0x6   :  { %20 = vsyncpa [#allocation9], 0 }
   0x7   :  { %21 = vsyncpa [#allocation4], 0 }
   0x8   :  { %23 = vsyncpa [#allocation4 + $0x1], 0 }
   0x9   :  { %24 = vsyncpa [#allocation12], 0 }
   0xa   :  { %26 = vsyncpa [#allocation12 + $0x1], 0  ;;  %s1675_s21 = smov 0   ;;  %s1677_s22 = smov 0  }
   0xb   :  { %s1679_s23 = smov 0   ;;  %s1681_s24 = smov 0  }
   0xc LB: > { %1949 = sst [smem:[#allocation18_spill]] %s1592_s23  ;;  %s1696_s25 = sadd.s32 4294967295, %s1596_s24   ;;  %s1596_s24 = sphi %s1681_s24, %s1969_s24   ;;  %s1592_s23 = sphi %s1679_s23, %s1971_s23   ;;  %s1588_s22 = sphi %s1677_s22, %s1973_s22   ;;  %s1584_s21 = sphi %s1675_s21, %s1972_s21  }
   0xd   : > { %s1148_s26 = sadd.s32 4294967294, %s1596_s24   ;;  %s1700_s27 = sadd.s32 1, %s1596_s24  }
   0xe   : > { %1950 = sst [smem:[#allocation19_spill]] %s1700_s27  ;;  %s280_s28 = sadd.s32 1, %s1592_s23 }
   0xf   : > { %s277_s29 = ssub.s32 %s1596_s24, %s1700_s27  ;;  %p290_p0 = scmp.ne.s32.totalorder %s1592_s23, %s1588_s22 }
  0x10   : > { %p278_p1 = scmp.eq.s32.totalorder %s277_s29, 0  ;;  %p291_p2 = scmp.eq.s32.totalorder %s1696_s25, 1 }
  0x11   : > { %p296_p3 = scmp.ne.s32.totalorder %s1588_s22, %s1584_s21  ;;  %p297_p4 = scmp.eq.s32.totalorder %s1148_s26, 1 }
  0x12   : > { %s1711_s30 = scalar_select %p278_p1, %s1592_s23, %s280_s28  }
  0x13   : > { %p1713_p5 = por %p291_p2, %p290_p0  ;;  %p1717_p6 = por %p297_p4, %p296_p3 }
  0x14   : > { %1951 = sst [smem:[#allocation20_spill]] %s1711_s30  ;;  %p1149_p7 = scmp.ge.s32.totalorder %s1596_s24, 1 }
  0x15   : > { %s1952_s13 = scalar_select %p1713_p5, 1, 0 }
  0x16   : > { %s1953_s14 = scalar_select %p1717_p6, 1, 0 }
  0x17   : > { %p330_p8 = scmp.lt.s32.totalorder %s1596_s24, 3  ;;  %p1941_p9 = scmp.eq.s32.totalorder %s1696_s25, 0 }
  0x18   : > { %s1598_s16 = smov [#allocation5]   ;;  %s1599_s19 = smov [#allocation2]  }
  0x19   : > { %p1724_p10 = pnand %p1149_p7, %p330_p8  ;;  %s361_s17 = sshll.u32 %s1598_s16, 4  ;;  %s362_s17 = int_to_ptr.vmem [resolvable:$true] %s361_s17 }
  0x1a   : > { %s342_s20 = sshll.u32 %s1599_s19, 4  ;;  %s1600_s26 = smov [#allocation7]   ;;  %s343_s20 = int_to_ptr.vmem [resolvable:$true] %s342_s20 }
  0x1b   : > { %p1319_p11 = pneg %p1724_p10  ;;  %s377_s28 = sshll.u32 %s1600_s26, 4  ;;  %s378_s28 = int_to_ptr.vmem [resolvable:$true] %s377_s28 }
  0x1c   : > { %s1401_s29 = scalar_lea.vmem %s362_s17, 2048  ;;  %p1409_p3 = scmp.lt.s32.totalorder %s362_s17, %s362_s17 }
  0x1d   : > { %p1732_p12 = pnand %p1941_p9, %p1319_p11  ;;  %p1402_p0 = scmp.ne.s32.totalorder %s362_s17, %s1401_s29 }
  0x1e   : > { %p1410_p4 = scmp.lt.s32.totalorder %s1401_s29, %s1401_s29 }
  0x1f   : > { %p1392_p13 = pneg %p1732_p12 }
  0x20   : > { %p1411_p7 = por %p1410_p4, %p1409_p3 }
  0x21   : > { %p1404_p1 = pnand %p1402_p0, %p1392_p13 }
  0x23   : > { %p1405_p2 = pneg %p1404_p1 }
  0x25   : > { %p1412_p8 = pnand %p1411_p7, %p1405_p2 }
  0x27   : > { %1415 = shalt.err (!%p1412_p8)
}
  0x28   : > { %s1601_s16 = smov 128   ;;  %s1602_s19 = smov 8  }
  0x29   : > { %1325 = dma.hbm_to_vmem [thread:$0]  (!%p1732_p12), %s1932_s5, 2048, %s362_s17, [#allocation6], %s1601_s16, %s1601_s16, %s1602_s19  }
  0x2a   : > { %s1427_s23 = scalar_lea.vmem %s343_s20, 256  ;;  %p1435_p9 = scmp.lt.s32.totalorder %s343_s20, %s343_s20 }
  0x2b   : > { %p1428_p11 = scmp.ne.s32.totalorder %s343_s20, %s1427_s23  ;;  %p1436_p6 = scmp.lt.s32.totalorder %s1427_s23, %s1427_s23 }
  0x2d   : > { %p1430_p0 = pnand %p1428_p11, %p1392_p13  ;;  %p1437_p3 = por %p1436_p6, %p1435_p9 }
  0x2f   : > { %p1431_p1 = pneg %p1430_p0 }
  0x31   : > { %p1438_p2 = pnand %p1437_p3, %p1431_p1 }
  0x33   : > { %1441 = shalt.err (!%p1438_p2)
}
  0x34   : > { %s1956_s2 = sld [smem:[#allocation23_spill]]  ;;  %s1453_s30 = scalar_lea.vmem %s378_s28, 2048 }
  0x35   : > { %p1454_p4 = scmp.ne.s32.totalorder %s378_s28, %s1453_s30  ;;  %p1461_p11 = scmp.lt.s32.totalorder %s378_s28, %s378_s28 }
  0x36   : > { %p1462_p0 = scmp.lt.s32.totalorder %s1453_s30, %s1453_s30 }
  0x37   : > { %p1456_p7 = pnand %p1454_p4, %p1392_p13 }
  0x38   : > { %p1463_p5 = por %p1462_p0, %p1461_p11 }
  0x39   : > { %p1457_p8 = pneg %p1456_p7 }
  0x3a   : > { %1322 = dma.hbm_to_vmem [thread:$0]  (!%p1732_p12), %s1956_s2, 256, %s343_s20, [#allocation3], %s1601_s16, %s1601_s16, %s1602_s19  }
  0x3b   : > { %p1464_p6 = pnand %p1463_p5, %p1457_p8 }
  0x3d   : > { %1467 = shalt.err (!%p1464_p6)
}
  0x3e   : > { %1328 = dma.hbm_to_vmem [thread:$0]  (!%p1732_p12), %s1934_s7, 2048, %s378_s28, [#allocation6], %s1601_s16, %s1601_s16, %s1602_s19  }
  0x3f   : > { %s1603_s27 = smov [#allocation8]  }
  0x40   : > { %s393_s20 = sshll.u32 %s1603_s27, 4  ;;  %s394_s20 = int_to_ptr.vmem [resolvable:$true] %s393_s20 }
  0x41   : > { %s1479_s26 = scalar_lea.vmem %s394_s20, 4096  ;;  %p1487_p2 = scmp.lt.s32.totalorder %s394_s20, %s394_s20 }
  0x42   : > { %p1480_p9 = scmp.ne.s32.totalorder %s394_s20, %s1479_s26  ;;  %p1488_p4 = scmp.lt.s32.totalorder %s1479_s26, %s1479_s26 }
  0x44   : > { %p1482_p1 = pnand %p1480_p9, %p1392_p13  ;;  %p1489_p5 = por %p1488_p4, %p1487_p2 }
  0x46   : > { %p1483_p3 = pneg %p1482_p1 }
  0x48   : > { %p1490_p7 = pnand %p1489_p5, %p1483_p3 }
  0x4a   : > { %1493 = shalt.err (!%p1490_p7)
}
  0x4b   : > { %s1604_s29 = smov 256   ;;  %s1605_s30 = smov 16  }
  0x4c   : > { %1331 = dma.hbm_to_vmem [thread:$0]  (!%p1732_p12), %s1936_s9, 4096, %s394_s20, [#allocation9], %s1604_s29, %s1604_s29, %s1605_s30  }
  0x4d   : > { %426 = sbr.rel (%p1724_p10) target bundleno = 927 (0x39f), region = 64  ;;  %p1957_p8 = scmp.eq.s32.totalorder (!%p1724_p10), %s1696_s25, 0 }
  0x52   : > { %1563 = dma.done.wait (%p1957_p8), [#allocation3], 256   ;;  %p1958_p13 = pmov %p1957_p8 }
  0x53   : > { %p1959_p11 = pmov %p1957_p8 }
  0x54   : > { %1565 = vsyncadd (%p1958_p13), [#allocation3], 4294967040 }
  0x55   : > { %1567 = dma.done.wait (%p1959_p11), [#allocation6], 4096   ;;  %p1960_p0 = pmov %p1957_p8 }
  0x57   : > { %1569 = vsyncadd (%p1960_p0), [#allocation6], 4294963200  ;;  %p1961_p6 = pmov %p1960_p0 }
  0x58   : > { %p1962_p12 = pmov %p1960_p0 }
  0x59   : > { %1571 = dma.done.wait (%p1961_p6), [#allocation9], 4096  }
  0x5a   : > { %1573 = vsyncadd (%p1962_p12), [#allocation9], 4294963200  ;;  %p488_p10 = scmp.lt.s32.totalorder %s1696_s25, 1  ;;  %v1606_v0 = vmov 0.0   ;;  %vm1607_vm0 = vmmov 0   ;;  %vm505_vm1 = vcmask 1043456  }
  0x5b   : > { %1217 = vmatprep.subr.mxu1 %v1606_v0  ;;  %1219 = vmatprep.mubr.msk.f32.mxu1 %vm1607_vm0, %v1606_v0  ;;  %s1963_s1 = sld [smem:[#allocation22_spill]]  ;;  %vm501_vm2 = vcmask 31744   ;;  %v500_v1 = vld [vmem:[%s1930_s3] sm:$0xf]  ;;  %v498_v3 = vld [vmem:[#allocation2 + $0x8] sm:$0xf] }
  0x5c   : > { %s489_s15 = scalar_select %p488_p10, %s1696_s25, 1  ;;  %1229 = vmatprep.subr.mxu0 %v1606_v0  ;;  %1261 = vmatprep.mubr.msk.f32.mxu0 %vm1607_vm0, %v1606_v0  ;;  %v680_v4 = vld [vmem:[#allocation5 + $0x78] sm:$0xff]  ;;  %v497_v5 = vld [vmem:[#allocation2] sm:$0xff]  ;;  %vm579_vm3 = vcmask 97280   ;;  %v678_v8 = vld [vmem:[#allocation5 + $0x68] sm:$0xff] }
  0x5d   : > { %s1964_s0 = sld [smem:[#allocation21_spill]]  ;;  %1218 = vmatpush3.msk.msra.mxu1 %vm505_vm1, %v500_v1  ;;  %v679_v7 = vld [vmem:[#allocation5 + $0x70] sm:$0xff]  ;;  %1230 = vmatpush3.msra.mxu0 %v680_v4  ;;  %v677_v9 = vld [vmem:[#allocation5 + $0x60] sm:$0xff]  ;;  %v676_v10 = vld [vmem:[#allocation5 + $0x58] sm:$0xff]  ;;  %s1945_s29 = sshll.u32 %s1696_s25, 7 }
  0x5e   : > { %s1162_s18 = sshll.u32 %s489_s15, 3  ;;  %1222 = vmatprep.subr.mxu1 %v1606_v0  ;;  %1231 = vmatprep.subr.mxu0 %v1606_v0  ;;  %v675_v11 = vld [vmem:[#allocation5 + $0x50] sm:$0xff]  ;;  %v674_v12 = vld [vmem:[#allocation5 + $0x48] sm:$0xff]  ;;  %v673_v13 = vld [vmem:[#allocation5 + $0x40] sm:$0xff]  ;;  %p1965_p1 = scmp.ne.s32.totalorder %s1952_s13, 0 }
  0x5f   : > { %1232 = vmatpush3.msra.mxu0 %v679_v7  ;;  %v672_v14 = vld [vmem:[#allocation5 + $0x38] sm:$0xff]  ;;  %v671_v15 = vld [vmem:[#allocation5 + $0x30] sm:$0xff]  ;;  %v670_v16 = vld [vmem:[#allocation5 + $0x28] sm:$0xff]  ;;  %s1608_s28 = smov [#allocation10]  }
  0x60   : > { %1233 = vmatprep.subr.mxu0 %v1606_v0  ;;  %v669_v17 = vld [vmem:[#allocation5 + $0x20] sm:$0xff]  ;;  %v668_v18 = vld [vmem:[#allocation5 + $0x18] sm:$0xff]  ;;  %v667_v19 = vld [vmem:[#allocation5 + $0x10] sm:$0xff]  ;;  %s1498_s15 = sshll.u32 %s1608_s28, 4  ;;  %s1499_s15 = int_to_ptr.vmem [resolvable:$false] %s1498_s15 }
  0x61   : > { %s495_s17 = scalar_lea.vmem %s1963_s1, %s1162_s18  ;;  %1234 = vmatpush3.msra.mxu0 %v678_v8  ;;  %v666_v20 = vld [vmem:[#allocation5 + $0x8] sm:$0xff]  ;;  %v665_v21 = vld [vmem:[#allocation5] sm:$0xff]  ;;  %v774_v22 = vld [vmem:[#allocation7 + $0x78] sm:$0xff] }
  0x62   : > { %v499_v2 = vld [vmem:[%s495_s17] sm:$0xff]  ;;  %1235 = vmatprep.subr.mxu0 %v1606_v0  ;;  %v772_v24 = vld [vmem:[#allocation7 + $0x68] sm:$0xff]  ;;  %v771_v25 = vld [vmem:[#allocation7 + $0x60] sm:$0xff]  ;;  %s1849_s17 = sand.u32 1, %s1588_s22  }
  0x63   : > { %s491_s30 = scalar_lea.vmem %s1964_s0, %s1162_s18  ;;  %1220 = vmatmul.mubr.msk.f32.vlgmr.msra.gmra.mxu1 %vm501_vm2, %v499_v2  ;;  %1236 = vmatpush3.msra.mxu0 %v677_v9  ;;  %v773_v23 = vld [vmem:[#allocation7 + $0x70] sm:$0xff]  ;;  %v770_v26 = vld [vmem:[#allocation7 + $0x58] sm:$0xff]  ;;  %v768_v28 = vld [vmem:[#allocation7 + $0x48] sm:$0xff]  ;;  %s1160_s27 = sshll.u32 %s1849_s17, 3 }
  0x64   : > { %1223 = vmatpush3.msk.msra.mxu1 %vm505_vm1, %v498_v3  ;;  %1226 = vmatprep.mubr.msk.f32.mxu1 %vm1607_vm0, %v1606_v0  ;;  %v496_v6 = vld [vmem:[%s491_s30] sm:$0xff]  ;;  %v767_v29 = vld [vmem:[#allocation7 + $0x40] sm:$0xff]  ;;  %v766_v30 = vld [vmem:[#allocation7 + $0x38] sm:$0xff]  ;;  %s480_s30 = scalar_lea.vmem [#allocation10], %s1160_s27  ;;  %s1861_s18 = scalar_lea.hbm %s1938_s11, %s1945_s29 }
  0x65   : > { %1224 = vmatprep.subr.mxu1 %v1606_v0  ;;  %1237 = vmatprep.subr.mxu0 %v1606_v0  ;;  %v769_v27 = vld [vmem:[#allocation7 + $0x50] sm:$0xff]  ;;  %v764_v32 = vld [vmem:[#allocation7 + $0x28] sm:$0xff]  ;;  %v763_v33 = vld [vmem:[#allocation7 + $0x20] sm:$0xff]  ;;  %s991_s23 = sshll.u32 %s480_s30, 4  ;;  %s1865_s16 = scalar_lea.vmem [#allocation11], %s1160_s27  ;;  %s1863_s23 = int_to_ptr.vmem [resolvable:$true] %s991_s23 }
  0x66   : > { %1225 = vmatpush3.msra.mxu1 %v497_v5  ;;  %1238 = vmatpush3.msra.mxu0 %v676_v10  ;;  %v765_v31 = vld [vmem:[#allocation7 + $0x30] sm:$0xff]  ;;  %v762_v34 = vld [vmem:[#allocation7 + $0x18] sm:$0xff]  ;;  %v760_v44 = vld [vmem:[#allocation7 + $0x8] sm:$0xff]  ;;  %s973_s20 = scalar_lea.sflag [#allocation4], %s1849_s17  ;;  %s1494_s26 = scalar_lea.vmem %s1863_s23, 128 }
  0x67   : > { %1227 = vmatmul.mubr.msk.f32.vlgmr.msra.gmra.mxu1 %vm579_vm3, %v496_v6  ;;  %1264 = vmatprep.subr.mxu1 %v1606_v0  ;;  %v1168_v38 = vld [vmem:[%s1931_s4] ss:$0 sm:$0xff]  ;;  %v759_v45 = vld [vmem:[#allocation7] sm:$0xff]  ;;  %v884_v46 = vld [vmem:[#allocation8 + $0xf8] sm:$0xff]  ;;  %p1495_p9 = scmp.ne.s32.totalorder %s1863_s23, %s1494_s26  ;;  %s1500_s29 = scalar_lea.vmem %s1499_s15, 256 }
  0x68   : > { %1296 = vmatprep.mubr.msk.f32.mxu1 %vm1607_vm0, %v1606_v0  ;;  %1239 = vmatprep.subr.mxu0 %v1606_v0  ;;  %v761_v43 = vld [vmem:[#allocation7 + $0x10] sm:$0xff]  ;;  %v882_v48 = vld [vmem:[#allocation8 + $0xe8] sm:$0xff]  ;;  %v881_v49 = vld [vmem:[#allocation8 + $0xe0] sm:$0xff]  ;;  %p1501_p4 = scmp.lt.s32.totalorder %s1863_s23, %s1499_s15  ;;  %p1502_p5 = scmp.lt.s32.totalorder %s1500_s29, %s1494_s26 }
  0x69   : > { %1240 = vmatpush3.msra.mxu0 %v675_v11  ;;  %1265 = vmatpush3.msra.mxu1 %v774_v22  ;;  %v883_v47 = vld [vmem:[#allocation8 + $0xf0] sm:$0xff]  ;;  %v880_v50 = vld [vmem:[#allocation8 + $0xd8] sm:$0xff]  ;;  %v878_v52 = vld [vmem:[#allocation8 + $0xc8] sm:$0xff]  ;;  %p1496_p3 = pnand %p1495_p9, %p1965_p1 }
  0x6a   : > { %1241 = vmatprep.subr.mxu0 %v1606_v0  ;;  %1266 = vmatprep.subr.mxu1 %v1606_v0  ;;  %v879_v51 = vld [vmem:[#allocation8 + $0xd0] sm:$0xff]  ;;  %v877_v53 = vld [vmem:[#allocation8 + $0xc0] sm:$0xff]  ;;  %v876_v54 = vld [vmem:[#allocation8 + $0xb8] sm:$0xff]  ;;  %p1503_p7 = por %p1502_p5, %p1501_p4 }
  0x6b   : > { %1242 = vmatpush3.msra.mxu0 %v674_v12  ;;  %1267 = vmatpush3.msra.mxu1 %v773_v23  ;;  %v875_v55 = vld [vmem:[#allocation8 + $0xb0] sm:$0xff]  ;;  %v874_v56 = vld [vmem:[#allocation8 + $0xa8] sm:$0xff]  ;;  %v873_v57 = vld [vmem:[#allocation8 + $0xa0] sm:$0xff]  ;;  %p1497_p2 = pneg %p1496_p3 }
  0x6c   : > { %1243 = vmatprep.subr.mxu0 %v1606_v0  ;;  %1268 = vmatprep.subr.mxu1 %v1606_v0  ;;  %v872_v58 = vld [vmem:[#allocation8 + $0x98] sm:$0xff]  ;;  %v871_v59 = vld [vmem:[#allocation8 + $0x90] sm:$0xff]  ;;  %v870_v60 = vld [vmem:[#allocation8 + $0x88] sm:$0xff] }
  0x6d   : > { %1244 = vmatpush3.msra.mxu0 %v673_v13  ;;  %1269 = vmatpush3.msra.mxu1 %v772_v24  ;;  %v869_v61 = vld [vmem:[#allocation8 + $0x80] sm:$0xff]  ;;  %v868_v62 = vld [vmem:[#allocation8 + $0x78] sm:$0xff]  ;;  %v867_v63 = vld [vmem:[#allocation8 + $0x70] sm:$0xff]  ;;  %v887_v24 = vlaneseq  ;;  %p1504_p8 = pnand %p1503_p7, %p1497_p2 }
  0x6e   : > { %1245 = vmatprep.subr.mxu0 %v1606_v0  ;;  %1270 = vmatprep.subr.mxu1 %v1606_v0  ;;  %v865_v1 = vld [vmem:[#allocation8 + $0x60] sm:$0xff]  ;;  %v864_v2 = vld [vmem:[#allocation8 + $0x58] sm:$0xff]  ;;  %v863_v3 = vld [vmem:[#allocation8 + $0x50] sm:$0xff] }
  0x6f   : > { %1246 = vmatpush3.msra.mxu0 %v672_v14  ;;  %1271 = vmatpush3.msra.mxu1 %v771_v25  ;;  %v862_v4 = vld [vmem:[#allocation8 + $0x48] sm:$0xff]  ;;  %v861_v5 = vld [vmem:[#allocation8 + $0x40] sm:$0xff]  ;;  %v860_v6 = vld [vmem:[#allocation8 + $0x38] sm:$0xff]  ;;  %v888_v25 = vshrl.u32 %v887_v24, 7 }
  0x70   : > { %1247 = vmatprep.subr.mxu0 %v1606_v0  ;;  %1272 = vmatprep.subr.mxu1 %v1606_v0  ;;  %v859_v7 = vld [vmem:[#allocation8 + $0x30] sm:$0xff]  ;;  %v858_v8 = vld [vmem:[#allocation8 + $0x28] sm:$0xff]  ;;  %v857_v14 = vld [vmem:[#allocation8 + $0x20] sm:$0xff] }
  0x71   : > { %1248 = vmatpush3.msra.mxu0 %v671_v15  ;;  %1273 = vmatpush3.msra.mxu1 %v770_v26  ;;  %v1169_v9 = vld [vmem:[%s1933_s6] ss:$0 sm:$0xff]  ;;  %v856_v15 = vld [vmem:[#allocation8 + $0x18] sm:$0xff]  ;;  %v889_v26 = vsub.s32 0, %v888_v25 }
  0x72   : > { %1249 = vmatprep.subr.mxu0 %v1606_v0  ;;  %1274 = vmatprep.subr.mxu1 %v1606_v0 }
  0x73   : > { %1250 = vmatpush3.msra.mxu0 %v670_v16  ;;  %1275 = vmatpush3.msra.mxu1 %v769_v27  ;;  %v855_v16 = vld [vmem:[#allocation8 + $0x10] sm:$0xff] }
  0x74   : > { %1251 = vmatprep.subr.mxu0 %v1606_v0  ;;  %1276 = vmatprep.subr.mxu1 %v1606_v0  ;;  %v885_v27 = vld [vmem:[%s1937_s10] sm:$0x3] }
  0x75   : > { %1252 = vmatpush3.msra.mxu0 %v669_v17  ;;  %1277 = vmatpush3.msra.mxu1 %v768_v28  ;;  %v854_v17 = vld [vmem:[#allocation8 + $0x8] sm:$0xff]  ;;  %v893_v28 = vsub.s32 1, %v888_v25 }
  0x76   : > { %1253 = vmatprep.subr.mxu0 %v1606_v0  ;;  %1278 = vmatprep.subr.mxu1 %v1606_v0 }
  0x77   : > { %1254 = vmatpush3.msra.mxu0 %v668_v18  ;;  %1279 = vmatpush3.msra.mxu1 %v767_v29  ;;  %v853_v18 = vld [vmem:[#allocation8] sm:$0xff]  ;;  %v890_v29 = vrot.slane %v885_v27, %v889_v26 }
  0x78   : > { %1255 = vmatprep.subr.mxu0 %v1606_v0  ;;  %1280 = vmatprep.subr.mxu1 %v1606_v0 }
  0x79   : > { %1256 = vmatpush3.msra.mxu0 %v667_v19  ;;  %1281 = vmatpush3.msra.mxu1 %v766_v30  ;;  %v1170_v19 = vld [vmem:[%s1935_s8] ss:$0 sm:$0xff]  ;;  %v894_v30 = vrot.slane %v885_v27, %v893_v28 }
  0x7a   : > { %1257 = vmatprep.subr.mxu0 %v1606_v0  ;;  %1282 = vmatprep.subr.mxu1 %v1606_v0 }
  0x7b   : > { %1258 = vmatpush3.msra.mxu0 %v666_v20  ;;  %1283 = vmatpush3.msra.mxu1 %v765_v31 }
  0x7c   : > { %1259 = vmatprep.subr.mxu0 %v1606_v0  ;;  %1284 = vmatprep.subr.mxu1 %v1606_v0 }
  0x7d   : > { %1260 = vmatpush3.msra.mxu0 %v665_v21  ;;  %1285 = vmatpush3.msra.mxu1 %v764_v32 }
  0x7e   : > { %1286 = vmatprep.subr.mxu1 %v1606_v0  ;;  %897 = vmatprep.subr.mxu0 %v884_v46 }
  0x7f   : > { %1287 = vmatpush3.msra.mxu1 %v763_v33 }
  0x80   : > { %1288 = vmatprep.subr.mxu1 %v1606_v0 }
  0x81   : > { %1289 = vmatpush3.msra.mxu1 %v762_v34 }
  0x82   : > { %1290 = vmatprep.subr.mxu1 %v1606_v0 }
  0x83   : > { %1291 = vmatpush3.msra.mxu1 %v761_v43 }
  0x84   : > { %1292 = vmatprep.subr.mxu1 %v1606_v0 }
  0x85   : > { %1293 = vmatpush3.msra.mxu1 %v760_v44 }
  0x86   : > { %1294 = vmatprep.subr.mxu1 %v1606_v0 }
  0x87   : > { %1295 = vmatpush3.msra.mxu1 %v759_v45 }
 0x123   : > { %v575_v35 = vpop.f32.mrf.mxu1 }
 0x125   : > { %v1221_v36 = vpop.f32.mrf.mxu1 }
 0x127   : > { %v652_v37 = vpop.f32.mrf.mxu1 }
 0x128   : > { %v653_v39 = vadd.f32 %v652_v37, %v575_v35 }
 0x129   : > { %v1228_v40 = vpop.f32.mrf.mxu1 }
 0x12a   : > { %v663_v41 = vadd.f32 %v1168_v38, %v653_v39 }
 0x12c   : > { %v664_v42 = vmax.f32 %v663_v41, 0.0 }
 0x12e   : > { %1262 = vmatmul.mubr.f32.vlgmr.msra.gmra.mxu0 %v664_v42 }
 0x12f   : > { %961 = vmatprep.mubr.f32.mxu0 %v1606_v0  ;;  %898 = vmatpush1.msra.mxu0 %v883_v47  ;;  %v866_v0 = vld [vmem:[#allocation8 + $0x68] sm:$0xff] }
 0x130   : > { %899 = vmatprep.subr.mxu0 %v882_v48 }
 0x131   : > { %900 = vmatpush1.msra.mxu0 %v881_v49 }
 0x132   : > { %901 = vmatprep.subr.mxu0 %v880_v50 }
 0x133   : > { %902 = vmatpush1.msra.mxu0 %v879_v51 }
 0x134   : > { %903 = vmatprep.subr.mxu0 %v878_v52 }
 0x135   : > { %904 = vmatpush1.msra.mxu0 %v877_v53 }
 0x136   : > { %905 = vmatprep.subr.mxu0 %v876_v54 }
 0x137   : > { %906 = vmatpush1.msra.mxu0 %v875_v55 }
 0x138   : > { %907 = vmatprep.subr.mxu0 %v874_v56 }
 0x139   : > { %908 = vmatpush1.msra.mxu0 %v873_v57 }
 0x13a   : > { %909 = vmatprep.subr.mxu0 %v872_v58 }
 0x13b   : > { %910 = vmatpush1.msra.mxu0 %v871_v59 }
 0x13c   : > { %911 = vmatprep.subr.mxu0 %v870_v60 }
 0x13d   : > { %912 = vmatpush1.msra.mxu0 %v869_v61 }
 0x13e   : > { %913 = vmatprep.subr.mxu0 %v868_v62 }
 0x13f   : > { %914 = vmatpush1.msra.mxu0 %v867_v63 }
 0x140   : > { %915 = vmatprep.subr.mxu0 %v866_v0 }
 0x141   : > { %916 = vmatpush1.msra.mxu0 %v865_v1 }
 0x142   : > { %917 = vmatprep.subr.mxu0 %v864_v2 }
 0x143   : > { %918 = vmatpush1.msra.mxu0 %v863_v3 }
 0x144   : > { %919 = vmatprep.subr.mxu0 %v862_v4 }
 0x145   : > { %920 = vmatpush1.msra.mxu0 %v861_v5 }
 0x146   : > { %921 = vmatprep.subr.mxu0 %v860_v6 }
 0x147   : > { %922 = vmatpush1.msra.mxu0 %v859_v7 }
 0x148   : > { %923 = vmatprep.subr.mxu0 %v858_v8 }
 0x149   : > { %924 = vmatpush1.msra.mxu0 %v857_v14 }
 0x14a   : > { %925 = vmatprep.subr.mxu0 %v856_v15 }
 0x14b   : > { %926 = vmatpush1.msra.mxu0 %v855_v16 }
 0x14c   : > { %927 = vmatprep.subr.mxu0 %v854_v17 }
 0x14d   : > { %928 = vmatpush1.msra.mxu0 %v853_v18 }
 0x1ee   : > { %v754_v10 = vpop.f32.mrf.mxu0 }
 0x1ef   : > { %v755_v11 = vadd.f32 %v1169_v9, %v754_v10 }
 0x1f0   : > { %v1263_v12 = vpop.f32.mrf.mxu0 }
 0x1f1   : > { %v758_v13 = vmax.f32 %v755_v11, 0.0 }
 0x1f3   : > { %1297 = vmatmul.mubr.f32.vlgmr.msra.gmra.mxu1 %v758_v13 }
 0x2b3   : > { %v848_v20 = vpop.f32.mrf.mxu1 }
 0x2b4   : > { %v849_v21 = vadd.f32 %v1170_v19, %v848_v20 }
 0x2b5   : > { %v1298_v22 = vpop.f32.mrf.mxu1 }
 0x2b6   : > { %v852_v23 = vmax.f32 %v849_v21, 0.0 }
 0x2b8   : > { %962 = vmatmul.mubr.f32.vlgmr.msra.gmra.mxu0 %v852_v23 }
 0x378   : > { %v963_v31 = vpop.f32.mrf.mxu0 }
 0x379   : > { %v964_v32 = vadd.f32 %v963_v31, %v890_v29 }
 0x37a   : > { %v965_v33 = vpop.f32.mrf.mxu0 }
 0x37b   : > { %968 = vst [vmem:[%s480_s30] sm:$0xff] %v964_v32  ;;  %v966_v34 = vadd.f32 %v965_v33, %v894_v30 }
 0x37c   : > { %1507 = shalt.err (!%p1504_p8)
}
 0x37d   : > { %s1508_s27 = scalar_lea.hbm %s1861_s18, 128  ;;  %s1512_s28 = scalar_lea.hbm %s1938_s11, 256 }
 0x37e   : > { %p1509_p13 = scmp.ne.s32.totalorder %s1861_s18, %s1508_s27  ;;  %p1513_p6 = scmp.lt.s32.totalorder %s1861_s18, %s1938_s11 }
 0x37f   : > { %p1514_p12 = scmp.lt.s32.totalorder %s1512_s28, %s1508_s27 }
 0x380   : > { %p1510_p11 = pnand %p1509_p13, %p1965_p1 }
 0x381   : > { %p1515_p10 = por %p1514_p12, %p1513_p6 }
 0x382   : > { %p1511_p0 = pneg %p1510_p11 }
 0x384   : > { %p1516_p9 = pnand %p1515_p10, %p1511_p0 }
 0x386   : > { %1519 = shalt.err (!%p1516_p9)
}
 0x387   : > { %1315 = dma.vmem_to_hbm [thread:$0]  (%p1965_p1), %s1863_s23, 128, %s1861_s18, %s973_s20   ;;  %v1171_v35 = vclamps-f32 %v966_v34, 16.0 }
 0x388   : > { %s1966_s29 = sshll.u32 %s1696_s25, 7  ;;  %s1967_s1 = sshll.u32 %s1865_s16, 4  ;;  %s1005_s1 = int_to_ptr.vmem [resolvable:$true] %s1967_s1 }
 0x389   : > { %s1002_s0 = scalar_lea.hbm %s1939_s12, %s1966_s29  ;;  %971 = vst [vmem:[%s1865_s16] sm:$0xff] %v1171_v35  ;;  %s978_s15 = scalar_lea.sflag [#allocation12], %s1849_s17 }
 0x38a   : > { %s1520_s27 = scalar_lea.vmem %s1005_s1, 128  ;;  %s1609_s30 = smov [#allocation11]  }
 0x38b   : > { %p1521_p3 = scmp.ne.s32.totalorder %s1005_s1, %s1520_s27  ;;  %s1524_s28 = sshll.u32 %s1609_s30, 4  ;;  %s1525_s28 = int_to_ptr.vmem [resolvable:$false] %s1524_s28 }
 0x38c   : > { %s1526_s2 = scalar_lea.vmem %s1525_s28, 256  ;;  %p1527_p5 = scmp.lt.s32.totalorder %s1005_s1, %s1525_s28 }
 0x38d   : > { %p1522_p2 = pnand %p1521_p3, %p1965_p1  ;;  %p1528_p7 = scmp.lt.s32.totalorder %s1526_s2, %s1520_s27 }
 0x38f   : > { %p1523_p4 = pneg %p1522_p2  ;;  %p1529_p8 = por %p1528_p7, %p1527_p5 }
 0x391   : > { %p1530_p13 = pnand %p1529_p8, %p1523_p4 }
 0x393   : > { %1533 = shalt.err (!%p1530_p13)
}
 0x394   : > { %s1534_s25 = scalar_lea.hbm %s1002_s0, 128  ;;  %s1538_s18 = scalar_lea.hbm %s1939_s12, 256 }
 0x395   : > { %p1535_p11 = scmp.ne.s32.totalorder %s1002_s0, %s1534_s25  ;;  %p1539_p12 = scmp.lt.s32.totalorder %s1002_s0, %s1939_s12 }
 0x396   : > { %p1540_p10 = scmp.lt.s32.totalorder %s1538_s18, %s1534_s25 }
 0x397   : > { %p1536_p0 = pnand %p1535_p11, %p1965_p1 }
 0x398   : > { %p1541_p9 = por %p1540_p10, %p1539_p12 }
 0x399   : > { %p1537_p6 = pneg %p1536_p0 }
 0x39b   : > { %p1542_p3 = pnand %p1541_p9, %p1537_p6 }
 0x39d   : > { %1545 = shalt.err (!%p1542_p3)
}
 0x39e   : > { %1316 = dma.vmem_to_hbm [thread:$0]  (%p1965_p1), %s1005_s1, 128, %s1002_s0, %s978_s15  }
 0x39f PF: > { %p1347_p2 = scmp.ge.s32.totalorder %s1596_s24, 2  ;;  %s1016_s2 = sand.u32 1, %s1584_s21  }
 0x3a0   : > { %p1968_p4 = scmp.ne.s32.totalorder %s1953_s14, 0  ;;  %s1017_s29 = scalar_lea.sflag [#allocation4], %s1016_s2 }
 0x3a2   : > { %p1333_p5 = pnand %p1347_p2, %p1968_p4 }
 0x3a4   : > { %p1334_p7 = pneg %p1333_p5 }
 0x3a6   : > { %1575 = dma.done.wait (%p1334_p7), %s1017_s29, 128  }
 0x3a7   : > { %1577 = vsyncadd (%p1334_p7), %s1017_s29, 4294967168  ;;  %s1026_s19 = scalar_lea.sflag [#allocation12], %s1016_s2 }
 0x3a8   : > { %1579 = dma.done.wait (%p1334_p7), %s1026_s19, 128  }
 0x3a9   : > { %1581 = vsyncadd (%p1334_p7), %s1026_s19, 4294967168  ;;  %s1969_s24 = sld [smem:[#allocation19_spill]]  ;;  %s1972_s21 = smov %s1588_s22 }
 0x3aa   : > { %s1970_s26 = sld [smem:[#allocation18_spill]] }
 0x3ab   : > { %s1971_s23 = sld [smem:[#allocation20_spill]] }
 0x3af   : > { %p29_p1 = scmp.ge.s32.totalorder %s1969_s24, 4  }
 0x3b0   : > { %s1973_s22 = smov %s1970_s26 }
 0x3b1   :  { %31 = sbr.rel (!%p29_p1) target bundleno = 12 (0xc), region = 136 }
 0x3b6   :  { %1031 = vsyncpa [#allocation3], 1 }
 0x3b7   :  { %1033 = vsyncpa [#allocation3 + $0x1], 1 }
 0x3b8   :  { %1034 = vsyncpa [#allocation6], 1 }
 0x3b9   :  { %1035 = vsyncpa [#allocation9], 1 }
 0x3ba   :  { %1036 = vsyncpa [#allocation4], 1 }
 0x3bb   :  { %1038 = vsyncpa [#allocation4 + $0x1], 1 }
 0x3bc   :  { %1039 = vsyncpa [#allocation12], 1 }
 0x3bd   :  { %1041 = vsyncpa [#allocation12 + $0x1], 1 }

</bundles_post_ra>
